<compile_context>
chip_gen: v6e
topology: v6e:2x2x1
jax: 0.10.0
libtpu: 0.0.40
codegen_flags: <defaults>
</compile_context>

<pallas_src>
import jax
import jax.numpy as jnp
from jax import lax
from jax.experimental import pallas as pl
from jax.experimental.pallas import tpu as pltpu

_BN_EPS = 1e-5


def _round_up(x, m):
    return (x + m - 1) // m * m


def _conv_taps(x_ref, w_ref):
    """Conv1d(k=3,s=1,p=1) on a channels-last, halo-padded tile.

    x_ref: (tb, L+2, Cin) zero-padded input; w_ref: (3, Cin, Cp) tap-major.
    Returns f32 (tb*L, Cp).
    """
    tb, Lp2, Cin = x_ref.shape
    L = Lp2 - 2

    def tap(k):
        xk = x_ref[:, k:k + L, :].reshape(tb * L, Cin)
        return jnp.dot(xk, w_ref[k], preferred_element_type=jnp.float32)

    return tap(0) + tap(1) + tap(2)


def _conv_stats_kernel(x_ref, w_ref, sum_ref, ssq_ref):
    # Per-tile partial per-channel sum and sum-of-squares of the conv output
    # (bias omitted; BatchNorm cancels it).  Each grid step owns its own
    # (1, 1, Cp) output block -> "parallel" grid, no init/revisit needed.
    Cp = w_ref.shape[2]
    acc = _conv_taps(x_ref, w_ref)                               # (tb*L, Cp) f32
    sum_ref[...] = jnp.sum(acc, axis=0, keepdims=True).reshape(1, 1, Cp)
    ssq_ref[...] = jnp.sum(acc * acc, axis=0, keepdims=True).reshape(1, 1, Cp)


def _conv_bn_pool_relu_kernel(x_ref, w_ref, scale_ref, shift_ref, o_ref, y_scr):
    # Conv recomputed (cheaper than round-tripping a lane-padded intermediate
    # through HBM when Cp >> 3*Cin), BN applied as a precomputed per-channel
    # affine, MaxPool1d(k=2,s=2,p=1) via two stride-2 sublane loads + max, ReLU.
    tb, Lp2, Cin = x_ref.shape
    L = Lp2 - 2
    Cp = w_ref.shape[2]
    M = L // 2                 # number of non-left-boundary pool windows
    n_even = (L + 1) // 2      # count of indices 0, 2, 4, ...

    acc = _conv_taps(x_ref, w_ref)                               # (tb*L, Cp) f32

    # BatchNorm1d with global batch statistics (track_running_stats=False),
    # folded into one FMA per element.
    y_scr[...] = (acc * scale_ref[...] + shift_ref[...]).reshape(tb, L, Cp)

    # MaxPool1d(k=2,s=2,p=1): window 0 -> y[0]; window m>0 -> max(y[2m-1], y[2m])
    # (the right element of the last window is padding when L is even).
    even = y_scr[:, pl.ds(0, n_even, 2), :]                      # y[0], y[2], ...
    odd = y_scr[:, pl.ds(1, M, 2), :]                            # y[1], y[3], ...
    odd_sh = jnp.concatenate([even[:, :1, :], odd], axis=1)      # (tb, M+1, Cp)
    if L % 2 == 0:
        even = jnp.concatenate([even, odd[:, M - 1:M, :]], axis=1)
    pooled = jnp.maximum(even, odd_sh)                           # (tb, L//2+1, Cp)

    # ReLU
    o_ref[...] = jnp.maximum(pooled, 0.0).astype(o_ref.dtype)


def blond_conv_net_layer(x, w, b, gamma, beta, *, compute_dtype=jnp.float32):
    """x: (N, Cin, L) like PyTorch NCL. Returns (N, Cout, L//2 + 1).

    compute_dtype=jnp.bfloat16 halves matmul-input DMA and doubles MXU
    throughput (f32 accumulation kept), at ~1e-2 relative accuracy.
    """
    N, Cin, L = x.shape
    Cout = w.shape[0]
    L_out = L // 2 + 1
    Cp = _round_up(Cout, 128)          # lane-dense channel axis

    # channels-last, padded once for the k=3 / pad=1 conv halo (fused by XLA
    # with the transpose).
    x_nlc = jnp.transpose(x, (0, 2, 1)).astype(jnp.float32)              # (N, L, Cin)
    x_pad = jnp.pad(x_nlc, ((0, 0), (1, 1), (0, 0))).astype(compute_dtype)  # (N, L+2, Cin)

    # conv weight (Cout, Cin, 3) -> (3, Cin, Cp), tap-major, lane-padded.
    w_t = jnp.transpose(w, (2, 1, 0)).astype(jnp.float32)                # (3, Cin, Cout)
    w_p = jnp.zeros((3, Cin, Cp), jnp.float32).at[:, :, :Cout].set(w_t).astype(compute_dtype)
    g_p = jnp.zeros((1, Cp), jnp.float32).at[0, :Cout].set(gamma.astype(jnp.float32))
    bt_p = jnp.zeros((1, Cp), jnp.float32).at[0, :Cout].set(beta.astype(jnp.float32))
    # The Conv1d bias is intentionally unused: BatchNorm subtracts the batch
    # mean per channel, so a constant per-channel bias cancels exactly.
    del b

    # batch tile = largest divisor of N whose per-step footprint stays small
    # (fits double-buffering well inside the 32 MiB scoped VMEM on all gens).
    x_bytes = jnp.dtype(compute_dtype).itemsize
    per_batch = (2 * (L + 2) * Cin * x_bytes        # double-buffered input tile
                 + 3 * L * Cp * 4                   # conv acc + BN scratch
                 + 3 * L_out * Cp * 4)              # pooled temps + output tile
    tb = 1
    for d in range(1, N + 1):
        if N % d == 0 and d * per_batch <= (4 << 20):
            tb = d
    G = N // tb

    cparams = pltpu.CompilerParams(
        dimension_semantics=("parallel",),
        vmem_limit_bytes=32 * 1024 * 1024)

    # ---- Phase 1: conv + per-tile partial per-channel sum / sum-of-squares ----
    psum, pssq = pl.pallas_call(
        _conv_stats_kernel,
        out_shape=[jax.ShapeDtypeStruct((G, 1, Cp), jnp.float32),
                   jax.ShapeDtypeStruct((G, 1, Cp), jnp.float32)],
        grid=(G,),
        in_specs=[
            pl.BlockSpec((tb, L + 2, Cin), lambda i: (i, 0, 0)),
            pl.BlockSpec((3, Cin, Cp), lambda i: (0, 0, 0)),
        ],
        out_specs=[
            pl.BlockSpec((1, 1, Cp), lambda i: (i, 0, 0)),
            pl.BlockSpec((1, 1, Cp), lambda i: (i, 0, 0)),
        ],
        compiler_params=cparams,
    )(x_pad, w_p)

    # Global batch stats + BN affine folded outside the kernels (tiny (1, Cp)
    # elementwise work; single-pass var = E[x^2] - mean^2).
    inv_count = 1.0 / float(N * L)
    mean = jnp.sum(psum, axis=0) * inv_count                     # (1, Cp)
    var = jnp.sum(pssq, axis=0) * inv_count - mean * mean
    scale = g_p * lax.rsqrt(var + _BN_EPS)
    shift = bt_p - mean * scale

    # ---- Phase 2: conv (recomputed) + BN affine + maxpool + ReLU ----
    out_nlc = pl.pallas_call(
        _conv_bn_pool_relu_kernel,
        out_shape=jax.ShapeDtypeStruct((N, L_out, Cp), jnp.float32),
        grid=(G,),
        in_specs=[
            pl.BlockSpec((tb, L + 2, Cin), lambda i: (i, 0, 0)),
            pl.BlockSpec((3, Cin, Cp), lambda i: (0, 0, 0)),
            pl.BlockSpec((1, Cp), lambda i: (0, 0)),
            pl.BlockSpec((1, Cp), lambda i: (0, 0)),
        ],
        out_specs=pl.BlockSpec((tb, L_out, Cp), lambda i: (i, 0, 0)),
        scratch_shapes=[pltpu.VMEM((tb, L, Cp), jnp.float32)],
        compiler_params=cparams,
    )(x_pad, w_p, scale, shift)

    # drop channel padding, back to PyTorch NCL layout.
    return jnp.transpose(out_nlc[:, :, :Cout], (0, 2, 1))


def _reference(x, w, b, gamma, beta):
    """Pure-JAX reference of the PyTorch module forward (any L parity)."""
    conv = lax.conv_general_dilated(
        x.astype(jnp.float32), w.astype(jnp.float32),
        window_strides=(1,), padding=[(1, 1)],
        dimension_numbers=("NCH", "OIH", "NCH"))
    conv = conv + b.reshape(1, -1, 1)
    mean = jnp.mean(conv, axis=(0, 2), keepdims=True)
    var = jnp.mean((conv - mean) ** 2, axis=(0, 2), keepdims=True)
    y = (conv - mean) * lax.rsqrt(var + _BN_EPS)
    y = y * gamma.reshape(1, -1, 1) + beta.reshape(1, -1, 1)
    pooled = lax.reduce_window(y, -jnp.inf, lax.max,
                               (1, 1, 2), (1, 1, 2),
                               [(0, 0), (0, 0), (1, 1)])
    return jnp.maximum(pooled, 0.0)


if __name__ == "__main__":
    def _run_case(N, Cin, L, Cout):
        key = jax.random.PRNGKey(0)
        kx, kw, kb, kg, kbeta = jax.random.split(key, 5)
        x = jax.random.normal(kx, (N, Cin, L), jnp.float32)
        w = jax.random.normal(kw, (Cout, Cin, 3), jnp.float32) * 0.2   # Conv1d (O, I, K)
        b = jax.random.normal(kb, (Cout,), jnp.float32) * 0.1
        gamma = jnp.ones((Cout,), jnp.float32) + 0.1 * jax.random.normal(kg, (Cout,), jnp.float32)
        beta = 0.1 * jax.random.normal(kbeta, (Cout,), jnp.float32)

        out = jax.block_until_ready(blond_conv_net_layer(x, w, b, gamma, beta))
        ref = _reference(x, w, b, gamma, beta)
        assert out.shape == (N, Cout, L // 2 + 1), out.shape
        err = float(jnp.max(jnp.abs(out - ref)))
        assert jnp.allclose(out, ref, atol=1e-4, rtol=1e-4), err

    # shapes consistent with the module: batch=2, in_features=4, seq_len=16, out_features=8
    _run_case(2, 4, 16, 8)
    # odd seq_len exercises the max-pool boundary path
    _run_case(3, 5, 15, 10)
    print("KERNEL_OK")
</pallas_src>

<mosaic_0001>
module attributes {stable_mosaic.version = 11 : i64} {
  func.func @_conv_stats_kernel(%arg0: i32, %arg1: memref<2x18x4xf32, #tpu.memory_space<vmem>>, %arg2: memref<3x4x128xf32, #tpu.memory_space<vmem>>, %arg3: memref<1x1x128xf32, #tpu.memory_space<vmem>>, %arg4: memref<1x1x128xf32, #tpu.memory_space<vmem>>) attributes {dimension_semantics = [#tpu.dimension_semantics<parallel>], iteration_bounds = array<i64: 1>, scalar_prefetch = 0 : i64, scratch_operands = 0 : i64, tpu.core_type = #tpu.core_type<tc>, window_params = [{transform_indices = @transform_0, window_bounds = array<i64: 2, 18, 4>}, {pipeline_mode = #tpu.pipeline_mode<synchronous>, transform_indices = @transform_1, window_bounds = array<i64: 3, 4, 128>}, {transform_indices = @transform_2, window_bounds = array<i64: 1, 1, 128>}, {transform_indices = @transform_3, window_bounds = array<i64: 1, 1, 128>}]} {
    %c0 = arith.constant 0 : index
    %c0_0 = arith.constant 0 : index
    %c0_1 = arith.constant 0 : index
    %0 = vector.load %arg1[%c0, %c0_0, %c0_1] : memref<2x18x4xf32, #tpu.memory_space<vmem>>, vector<2x16x4xf32>
    %1 = vector.shape_cast %0 : vector<2x16x4xf32> to vector<32x4xf32>
    %c0_2 = arith.constant 0 : index
    %c0_3 = arith.constant 0 : index
    %c0_4 = arith.constant 0 : index
    %2 = vector.load %arg2[%c0_2, %c0_3, %c0_4] : memref<3x4x128xf32, #tpu.memory_space<vmem>>, vector<1x4x128xf32>
    %3 = vector.shape_cast %2 : vector<1x4x128xf32> to vector<4x128xf32>
    %cst = arith.constant dense<0.000000e+00> : vector<32x128xf32>
    %4 = tpu.matmul %1, %3, %cst {dimension_numbers = #tpu.dot_dimension_numbers<[1], [0], [0], [1], [0, 0, 1, 1], [], []>} : vector<32x4xf32>, vector<4x128xf32>, vector<32x128xf32> -> vector<32x128xf32>
    %c0_5 = arith.constant 0 : index
    %c1 = arith.constant 1 : index
    %c0_6 = arith.constant 0 : index
    %5 = vector.load %arg1[%c0_5, %c1, %c0_6] : memref<2x18x4xf32, #tpu.memory_space<vmem>>, vector<2x16x4xf32>
    %6 = vector.shape_cast %5 : vector<2x16x4xf32> to vector<32x4xf32>
    %c1_7 = arith.constant 1 : index
    %c0_8 = arith.constant 0 : index
    %c0_9 = arith.constant 0 : index
    %7 = vector.load %arg2[%c1_7, %c0_8, %c0_9] : memref<3x4x128xf32, #tpu.memory_space<vmem>>, vector<1x4x128xf32>
    %8 = vector.shape_cast %7 : vector<1x4x128xf32> to vector<4x128xf32>
    %cst_10 = arith.constant dense<0.000000e+00> : vector<32x128xf32>
    %9 = tpu.matmul %6, %8, %cst_10 {dimension_numbers = #tpu.dot_dimension_numbers<[1], [0], [0], [1], [0, 0, 1, 1], [], []>} : vector<32x4xf32>, vector<4x128xf32>, vector<32x128xf32> -> vector<32x128xf32>
    %10 = arith.addf %4, %9 : vector<32x128xf32>
    %c0_11 = arith.constant 0 : index
    %c2 = arith.constant 2 : index
    %c0_12 = arith.constant 0 : index
    %11 = vector.load %arg1[%c0_11, %c2, %c0_12] : memref<2x18x4xf32, #tpu.memory_space<vmem>>, vector<2x16x4xf32>
    %12 = vector.shape_cast %11 : vector<2x16x4xf32> to vector<32x4xf32>
    %c2_13 = arith.constant 2 : index
    %c0_14 = arith.constant 0 : index
    %c0_15 = arith.constant 0 : index
    %13 = vector.load %arg2[%c2_13, %c0_14, %c0_15] : memref<3x4x128xf32, #tpu.memory_space<vmem>>, vector<1x4x128xf32>
    %14 = vector.shape_cast %13 : vector<1x4x128xf32> to vector<4x128xf32>
    %cst_16 = arith.constant dense<0.000000e+00> : vector<32x128xf32>
    %15 = tpu.matmul %12, %14, %cst_16 {dimension_numbers = #tpu.dot_dimension_numbers<[1], [0], [0], [1], [0, 0, 1, 1], [], []>} : vector<32x4xf32>, vector<4x128xf32>, vector<32x128xf32> -> vector<32x128xf32>
    %16 = arith.addf %10, %15 : vector<32x128xf32>
    %cst_17 = arith.constant dense<0.000000e+00> : vector<128xf32>
    %17 = vector.multi_reduction <add>, %16, %cst_17 [0] : vector<32x128xf32> to vector<128xf32>
    %18 = vector.shape_cast %17 : vector<128xf32> to vector<1x128xf32>
    %19 = vector.shape_cast %18 : vector<1x128xf32> to vector<1x1x128xf32>
    %c0_18 = arith.constant 0 : index
    %c0_19 = arith.constant 0 : index
    %c0_20 = arith.constant 0 : index
    %20 = vector.load %arg3[%c0_18, %c0_19, %c0_20] : memref<1x1x128xf32, #tpu.memory_space<vmem>>, vector<1x1x128xf32>
    tpu.vector_store %arg3[%c0_18, %c0_19, %c0_20], %19 {strides = array<i32>} : memref<1x1x128xf32, #tpu.memory_space<vmem>>, vector<1x1x128xf32>,
    %21 = arith.mulf %16, %16 : vector<32x128xf32>
    %cst_21 = arith.constant dense<0.000000e+00> : vector<128xf32>
    %22 = vector.multi_reduction <add>, %21, %cst_21 [0] : vector<32x128xf32> to vector<128xf32>
    %23 = vector.shape_cast %22 : vector<128xf32> to vector<1x128xf32>
    %24 = vector.shape_cast %23 : vector<1x128xf32> to vector<1x1x128xf32>
    %c0_22 = arith.constant 0 : index
    %c0_23 = arith.constant 0 : index
    %c0_24 = arith.constant 0 : index
    %25 = vector.load %arg4[%c0_22, %c0_23, %c0_24] : memref<1x1x128xf32, #tpu.memory_space<vmem>>, vector<1x1x128xf32>
    tpu.vector_store %arg4[%c0_22, %c0_23, %c0_24], %24 {strides = array<i32>} : memref<1x1x128xf32, #tpu.memory_space<vmem>>, vector<1x1x128xf32>,
    return
  }
  func.func @transform_0(%arg0: i32) -> (i32, i32, i32) {
    %c0_i32 = arith.constant 0 : i32
    %c0_i32_0 = arith.constant 0 : i32
    %c0_i32_1 = arith.constant 0 : i32
    return %arg0, %c0_i32, %c0_i32_0 : i32, i32, i32
  }
  func.func @transform_1(%arg0: i32) -> (i32, i32, i32) {
    %c0_i32 = arith.constant 0 : i32
    %c0_i32_0 = arith.constant 0 : i32
    %c0_i32_1 = arith.constant 0 : i32
    %c0_i32_2 = arith.constant 0 : i32
    return %c0_i32, %c0_i32_0, %c0_i32_1 : i32, i32, i32
  }
  func.func @transform_2(%arg0: i32) -> (i32, i32, i32) {
    %c0_i32 = arith.constant 0 : i32
    %c0_i32_0 = arith.constant 0 : i32
    %c0_i32_1 = arith.constant 0 : i32
    return %arg0, %c0_i32, %c0_i32_0 : i32, i32, i32
  }
  func.func @transform_3(%arg0: i32) -> (i32, i32, i32) {
    %c0_i32 = arith.constant 0 : i32
    %c0_i32_0 = arith.constant 0 : i32
    %c0_i32_1 = arith.constant 0 : i32
    return %arg0, %c0_i32, %c0_i32_0 : i32, i32, i32
  }
}

</mosaic_0001>

<bundles_post_ra>
// kernel: tpu_custom_call.1
= control target key start
LH: loop header
LB: loop body
LE: loop exit
PB: predicated region body
PF: predicated region fallthrough
CT: control target
= control target key end

     0   :  { %9 = vsyncpa [#allocation3], 0  ;;  %vm39_vm0 = vcmask 1043456   ;;  %vm26_vm1 = vcmask 31744   ;;  %s587_s0 = inlined_call_operand.vmem [shape: f32[2,18,4], index: 0, kind: input, shape index: {}]   ;;  %s588_s1 = inlined_call_operand.vmem [shape: f32[3,4,128], index: 1, kind: input, shape index: {}]   ;;  %s589_s2 = inlined_call_operand.hbm [shape: f32[1,1,128], index: 2, kind: output, shape index: {0}]   ;;  %s590_s3 = inlined_call_operand.hbm [shape: f32[1,1,128], index: 3, kind: output, shape index: {1}]  }
   0x1   :  { %v390_v0 = vld [vmem:[%s588_s1 + $0x4] sm:$0xf]  ;;  %v22_v1 = vld [vmem:[%s587_s0 + $0x19] sm:$0xff]  ;;  %v21_v5 = vld [vmem:[%s587_s0 + $0x9] sm:$0xff] }
   0x2   :  { %v20_v2 = vld [vmem:[%s587_s0 + $0x1] sm:$0xff]  ;;  %446 = vmatprep.subr.msk.mxu1 %vm39_vm0, %v390_v0  ;;  %422 = vmatprep.subr.msk.mxu0 %vm39_vm0, %v390_v0 }
   0x3   :  { %v23_v3 = vld [vmem:[%s587_s0 + $0x21] sm:$0xff]  ;;  %447 = vmatpush3.msk.msra.mxu1 %vm39_vm0, %v390_v0  ;;  %427 = vmatprep.mubr.msk.f32.mxu1 %vm26_vm1, %v22_v1 }
   0x4   :  { %v19_v4 = vld [vmem:[%s588_s1] sm:$0xf]  ;;  %423 = vmatpush3.msk.msra.mxu0 %vm39_vm0, %v390_v0  ;;  %424 = vmatprep.mubr.msk.f32.mxu0 %vm26_vm1, %v20_v2  ;;  %v401_v6 = vld [vmem:[%s588_s1 + $0x8] sm:$0xf] }
   0x5   :  { %v15_v7 = vld [vmem:[%s587_s0] sm:$0xff]  ;;  %428 = vmatmul.mubr.msk.f32.vlgmr.msra.gmra.mxu1 %vm26_vm1, %v23_v3  ;;  %430 = vmatprep.subr.msk.mxu1 %vm39_vm0, %v19_v4  ;;  %v16_v9 = vld [vmem:[%s587_s0 + $0x8] sm:$0xff] }
   0x6   :  { %v228_v8 = vld [vmem:[%s587_s0 + $0x2] sm:$0xff]  ;;  %425 = vmatmul.mubr.msk.f32.vlgmr.msra.gmra.mxu0 %vm26_vm1, %v21_v5  ;;  %431 = vmatpush3.msk.msra.mxu1 %vm39_vm0, %v19_v4 }
   0x7   :  { %10 = vsyncpa [#allocation5], 0  ;;  %438 = vmatprep.subr.msk.mxu0 %vm39_vm0, %v401_v6  ;;  %432 = vmatprep.mubr.msk.f32.mxu1 %vm26_vm1, %v15_v7  ;;  %v229_v10 = vld [vmem:[%s587_s0 + $0xa] sm:$0xff]  ;;  %v17_v11 = vld [vmem:[%s587_s0 + $0x18] sm:$0xff]  ;;  %s495_s15 = smov [#allocation4]  }
   0x8   :  { %439 = vmatpush3.msk.msra.mxu0 %vm39_vm0, %v401_v6  ;;  %440 = vmatprep.mubr.msk.f32.mxu0 %vm26_vm1, %v228_v8  ;;  %v230_v12 = vld [vmem:[%s587_s0 + $0x1a] sm:$0xff]  ;;  %v231_v14 = vld [vmem:[%s587_s0 + $0x22] sm:$0xff]  ;;  %s378_s16 = sshll.u32 %s495_s15, 4  ;;  %s379_s16 = int_to_ptr.vmem [resolvable:$true] %s378_s16 }
   0x9   :  { %433 = vmatmul.mubr.msk.f32.vlgmr.msra.gmra.mxu1 %vm26_vm1, %v16_v9  ;;  %v18_v13 = vld [vmem:[%s587_s0 + $0x20] sm:$0xff]  ;;  %s494_s0 = smov [#allocation2]  }
   0xa   :  { %441 = vmatmul.mubr.msk.f32.vlgmr.msra.gmra.mxu0 %vm26_vm1, %v229_v10  ;;  %435 = vmatprep.mubr.msk.f32.mxu1 %vm26_vm1, %v17_v11  ;;  %s368_s14 = sshll.u32 %s494_s0, 4  ;;  %s369_s14 = int_to_ptr.vmem [resolvable:$true] %s368_s14 }
   0xb   :  { %443 = vmatprep.mubr.msk.f32.mxu0 %vm26_vm1, %v230_v12  ;;  %s450_s17 = scalar_lea.vmem %s369_s14, 16  ;;  %s454_s18 = scalar_lea.vmem %s369_s14, 32 }
   0xc   :  { %p451_p0 = scmp.ne.s32.totalorder %s369_s14, %s450_s17  ;;  %p455_p1 = scmp.lt.s32.totalorder %s369_s14, %s369_s14 }
   0xd   :  { %436 = vmatmul.mubr.msk.f32.gmra.mxu1 %vm26_vm1, %v18_v13  ;;  %p456_p2 = scmp.lt.s32.totalorder %s454_s18, %s450_s17 }
   0xe   :  { %444 = vmatmul.mubr.msk.f32.gmra.mxu0 %vm26_vm1, %v231_v14 }
   0xf   :  { %p457_p3 = por %p456_p2, %p455_p1 }
  0x11   :  { %p458_p4 = pnand %p457_p3, %p451_p0 }
  0xc5   :  { %v429_v15 = vpop.f32.mrf.mxu1 }
  0xc6   :  { %v426_v16 = vpop.f32.mrf.mxu0 }
  0xc7   :  { %v119_v17 = vpop.f32.mrf.mxu1 }
  0xc8   :  { %v109_v18 = vpop.f32.mrf.mxu0 }
  0xc9   :  { %v434_v19 = vpop.f32.mrf.mxu1 }
  0xca   :  { %v215_v20 = vadd.f32 %v434_v19, %v426_v16  ;;  %v442_v21 = vpop.f32.mrf.mxu0 }
  0xcb   :  { %v209_v22 = vpop.f32.mrf.mxu1 }
  0xcc   :  { %v210_v23 = vadd.f32 %v209_v22, %v109_v18  ;;  %v315_v24 = vpop.f32.mrf.mxu0  ;;  %v335_v26 = vadd.f32 %v442_v21, %v215_v20 }
  0xcd   :  { %v437_v25 = vpop.f32.mrf.mxu1 }
  0xce   :  { %v334_v27 = vadd.f32 %v315_v24, %v210_v23  ;;  %v225_v28 = vadd.f32 %v437_v25, %v429_v15  ;;  %v445_v29 = vpop.f32.mrf.mxu0  ;;  %v349_v34 = vmul.f32 %v335_v26, %v335_v26 }
  0xcf   :  { %v219_v30 = vpop.f32.mrf.mxu1 }
  0xd0   :  { %v348_v31 = vmul.f32 %v334_v27, %v334_v27  ;;  %v220_v32 = vadd.f32 %v219_v30, %v119_v17  ;;  %v325_v33 = vpop.f32.mrf.mxu0  ;;  %v338_v35 = vadd.f32 %v335_v26, %v334_v27  ;;  %v337_v36 = vadd.f32 %v445_v29, %v225_v28 }
  0xd2   :  { %v336_v37 = vadd.f32 %v325_v33, %v220_v32  ;;  %v352_v38 = vadd.f32 %v349_v34, %v348_v31  ;;  %v351_v41 = vmul.f32 %v337_v36, %v337_v36 }
  0xd4   :  { %v339_v39 = vadd.f32 %v338_v35, %v336_v37  ;;  %v350_v40 = vmul.f32 %v336_v37, %v336_v37 }
  0xd6   :  { %v340_v42 = vadd.f32 %v339_v39, %v337_v36  ;;  %v353_v43 = vadd.f32 %v352_v38, %v350_v40 }
  0xd8   :  { %v341_v44 = vrot.slane %v340_v42, 4  ;;  %v354_v45 = vadd.f32 %v353_v43, %v351_v41 }
  0xda   :  { %v342_v46 = vadd.f32 %v341_v44, %v340_v42  ;;  %v355_v47 = vrot.slane %v354_v45, 4 }
  0xdc   :  { %v343_v48 = vrot.slane %v342_v46, 2  ;;  %v356_v49 = vadd.f32 %v355_v47, %v354_v45 }
  0xde   :  { %v344_v50 = vadd.f32 %v343_v48, %v342_v46  ;;  %v357_v51 = vrot.slane %v356_v49, 2 }
  0xe0   :  { %v345_v52 = vrot.slane %v344_v50, 1  ;;  %v358_v53 = vadd.f32 %v357_v51, %v356_v49 }
  0xe2   :  { %v346_v54 = vadd.f32 %v345_v52, %v344_v50  ;;  %v359_v55 = vrot.slane %v358_v53, 1 }
  0xe4   :  { %347 = vst [vmem:[#allocation2] sm:$0x1] %v346_v54  ;;  %v360_v56 = vadd.f32 %v359_v55, %v358_v53 }
  0xe5   :  { %461 = shalt.err (!%p458_p4)
}
  0xe6   :  { %371 = dma.vmem_to_hbm [thread:$0]  %s369_s14, 16, %s589_s2, [#allocation3]   ;;  %361 = vst [vmem:[#allocation4] sm:$0x1] %v360_v56 }
  0xe7   :  { %s470_s21 = scalar_lea.vmem %s379_s16, 16  ;;  %s474_s22 = scalar_lea.vmem %s379_s16, 32 }
  0xe8   :  { %p471_p5 = scmp.ne.s32.totalorder %s379_s16, %s470_s21  ;;  %p475_p6 = scmp.lt.s32.totalorder %s379_s16, %s379_s16 }
  0xe9   :  { %p476_p7 = scmp.lt.s32.totalorder %s474_s22, %s470_s21 }
  0xeb   :  { %p477_p8 = por %p476_p7, %p475_p6 }
  0xed   :  { %p478_p9 = pnand %p477_p8, %p471_p5 }
  0xef   :  { %481 = shalt.err (!%p478_p9)
}
  0xf0   :  { %381 = dma.vmem_to_hbm [thread:$0]  %s379_s16, 16, %s590_s3, [#allocation5]  }
  0xf1   :  { %490 = dma.done.wait [#allocation3], 16  }
  0xf2   :  { %491 = vsyncadd [#allocation3], 4294967280 }
  0xf3   :  { %492 = dma.done.wait [#allocation5], 16  }
  0xf4   :  { %493 = vsyncadd [#allocation5], 4294967280 }
  0xf5   :  { %388 = vsyncpa [#allocation3], 1 }
  0xf6   :  { %389 = vsyncpa [#allocation5], 1 }

</bundles_post_ra>
